<compile_context>
chip_gen: v7x
topology: tpu7x:2x2x1
jax: 0.10.0
libtpu: 0.0.40
codegen_flags: <defaults>
</compile_context>

<pallas_src>
import functools

import jax
import jax.numpy as jnp
from jax.experimental import pallas as pl
from jax.experimental.pallas import tpu as pltpu


# ----------------------------------------------------------------------------
# Fused Pallas kernel: whole CoarseMaskHead forward for one sample per grid step
# ----------------------------------------------------------------------------
def _fused_head_kernel(*refs, has_reduce, num_fc, conv_dim, P, fc_dim):
    o_ref = refs[-1]                      # (1, out_dim)
    it = iter(refs[:-1])
    x_ref = next(it)                      # (4*Cin, P)  tap-stacked input pixels
    if has_reduce:
        w1_ref = next(it)                 # (4*conv_dim, 4*Cin)  block-diagonal 1x1 conv
        b1_ref = next(it)                 # (4*conv_dim, 1)
    w2_ref = next(it)                     # (conv_dim, 4*conv_dim_or_Cin)  2x2/s2 conv
    b2_ref = next(it)                     # (conv_dim, 1)
    fc_refs = [(next(it), next(it)) for _ in range(num_fc)]
    wp_ref = next(it)                     # (fc_dim, out_dim)
    bp_ref = next(it)                     # (1, out_dim)

    # ---- conv stage: two matmuls total (1x1 conv+ReLU over all taps, then 2x2/s2) --
    x = x_ref[...]
    if has_reduce:
        h = jnp.dot(w1_ref[...], x, preferred_element_type=jnp.float32)
        h = jnp.maximum(h + b1_ref[...], 0.0)          # (4*conv_dim, P)
    else:
        h = x.astype(jnp.float32)                      # (4*Cin, P)
    h2 = jnp.dot(w2_ref[...], h, preferred_element_type=jnp.float32)
    h2 = jnp.maximum(h2 + b2_ref[...], 0.0)            # (conv_dim, P): NCHW flatten order

    # ---- fc1: PyTorch flatten(start_dim=1) folded into a per-channel stacked weight
    w_fc1_ref, b_fc1_ref = fc_refs[0]                  # (conv_dim, P, fc_dim), (1, fc_dim)
    acc1 = jnp.zeros((1, fc_dim), jnp.float32)
    for c in range(conv_dim):
        acc1 = acc1 + jnp.dot(h2[c:c + 1, :], w_fc1_ref[c],
                              preferred_element_type=jnp.float32)
    feat = jnp.maximum(acc1 + b_fc1_ref[...], 0.0)     # (1, fc_dim)

    # ---- remaining FC layers (+ReLU) ----
    for k in range(1, num_fc):
        w_ref, b_ref = fc_refs[k]                      # (fc_dim, fc_dim), (1, fc_dim)
        feat = jnp.maximum(
            jnp.dot(feat, w_ref[...], preferred_element_type=jnp.float32)
            + b_ref[...], 0.0)

    # ---- prediction (no activation) ----
    pred = jnp.dot(feat, wp_ref[...], preferred_element_type=jnp.float32) + bp_ref[...]
    o_ref[...] = pred.astype(o_ref.dtype)


# ----------------------------------------------------------------------------
# CoarseMaskHead config + parameters (deterministic, synthetic init)
# ----------------------------------------------------------------------------
class CoarseMaskHeadParams:
    def __init__(
        self,
        key,
        *,
        num_classes=4,
        conv_dim=4,
        fc_dim=32,
        num_fc=2,
        output_side_resolution=7,
        input_channels=8,
        input_h=16,
        input_w=16,
        dtype=jnp.float32,
    ):
        assert num_fc >= 1
        assert input_h % 2 == 0 and input_w % 2 == 0
        self.num_classes = num_classes
        self.conv_dim = conv_dim
        self.fc_dim = fc_dim
        self.num_fc = num_fc
        self.output_side_resolution = output_side_resolution
        self.input_channels = input_channels
        self.input_h = input_h
        self.input_w = input_w

        ks = list(jax.random.split(key, 4 + 2 * num_fc))
        ki = iter(ks)

        self.has_reduce_channel = input_channels > conv_dim
        if self.has_reduce_channel:
            # Conv2d(input_channels -> conv_dim, 1x1), MSRA-style scale.
            fan_in = input_channels
            self.w_reduce_ch = (
                jax.random.normal(next(ki), (conv_dim, input_channels), dtype)
                * (2.0 / fan_in) ** 0.5
            )
            self.b_reduce_ch = jnp.zeros((conv_dim,), dtype)
        else:
            _ = next(ki)
            self.w_reduce_ch = None
            self.b_reduce_ch = None

        # Conv2d(conv_dim -> conv_dim, 2x2, stride 2), MSRA-style scale.
        fan_in = conv_dim * 2 * 2
        self.w_reduce_sp = (
            jax.random.normal(next(ki), (conv_dim, conv_dim, 2, 2), dtype)
            * (2.0 / fan_in) ** 0.5
        )
        self.b_reduce_sp = jnp.zeros((conv_dim,), dtype)

        # FC stack (Xavier-style scale).  input_dim follows the module exactly:
        input_dim = conv_dim * input_h * input_w
        input_dim //= 4
        self.fc_w = []
        self.fc_b = []
        for _ in range(num_fc):
            scale = (2.0 / (input_dim + fc_dim)) ** 0.5
            w = jax.random.normal(next(ki), (fc_dim, input_dim), dtype) * scale
            self.fc_w.append(w)
            self.fc_b.append(jnp.zeros((fc_dim,), dtype))
            input_dim = fc_dim

        # Prediction layer: normal(std=0.001), bias 0 (as in the module).
        output_dim = num_classes * output_side_resolution * output_side_resolution
        self.w_pred = (
            jax.random.normal(next(ki), (output_dim, fc_dim), dtype) * 0.001
        )
        self.b_pred = jnp.zeros((output_dim,), dtype)

        # One-time host-side re-layout of the weights for the fused kernel.
        self._pack_for_kernel()

    def _pack_for_kernel(self):
        H2, W2 = self.input_h // 2, self.input_w // 2
        P = H2 * W2
        C = self.conv_dim
        kp = {}
        if self.has_reduce_channel:
            # Block-diagonal stacking: the same 1x1 conv applied to all 4 taps at once.
            # bd[t*C + o, t*Cin + i] = w_reduce_ch[o, i]
            kp["w1"] = jnp.kron(jnp.eye(4, dtype=self.w_reduce_ch.dtype),
                                self.w_reduce_ch)                 # (4C, 4Cin)
            kp["b1"] = jnp.tile(self.b_reduce_ch, 4).reshape(4 * C, 1)
        # 2x2/stride-2 conv as one matmul over tap-stacked rows (t = kh*2+kw):
        # w2c[o, t*Ci + i] = w_reduce_sp[o, i, kh, kw]
        ci = self.w_reduce_sp.shape[1]
        w2c = jnp.transpose(self.w_reduce_sp, (2, 3, 1, 0)).reshape(4 * ci, C).T
        kp["w2"] = w2c                                            # (C, 4*ci)
        kp["b2"] = self.b_reduce_sp.reshape(C, 1)
        fc_w, fc_b = [], []
        # fc layer 0: fold PyTorch's NCHW channel-major flatten into the weight:
        # stacked[c, p, j] = W_fc0[j, c*P + p]
        w0 = self.fc_w[0].reshape(self.fc_dim, C, P)
        fc_w.append(jnp.transpose(w0, (1, 2, 0)))                 # (C, P, fc_dim)
        fc_b.append(self.fc_b[0].reshape(1, self.fc_dim))
        for k in range(1, self.num_fc):
            fc_w.append(self.fc_w[k].T)                           # (fc_dim, fc_dim)
            fc_b.append(self.fc_b[k].reshape(1, self.fc_dim))
        kp["fc_w"] = fc_w
        kp["fc_b"] = fc_b
        kp["w_pred"] = self.w_pred.T                              # (fc_dim, out_dim)
        kp["b_pred"] = self.b_pred.reshape(1, -1)                 # (1, out_dim)
        self.kernel_params = kp


# ----------------------------------------------------------------------------
# Forward pass: single fused pallas_call, grid over the batch dimension
# ----------------------------------------------------------------------------
def coarse_mask_head_forward(params: CoarseMaskHeadParams, x):
    """x: (N, input_channels, input_h, input_w)  [NCHW, same as PyTorch]."""
    p = params
    N = x.shape[0]
    Cin, H, W = p.input_channels, p.input_h, p.input_w
    H2, W2 = H // 2, W // 2
    P = H2 * W2
    C = p.conv_dim
    out_dim = p.num_classes * p.output_side_resolution * p.output_side_resolution

    x = x.reshape(N, Cin, H, W)
    # Single glue rearrangement: NCHW -> (N, 4*Cin, H2*W2) tap-stacked layout
    # (row index = (kh*2 + kw)*Cin + i), so both convs become one matmul each.
    x5 = x.reshape(N, Cin, H2, 2, W2, 2)
    x_taps = jnp.transpose(x5, (0, 3, 5, 1, 2, 4)).reshape(N, 4 * Cin, P)

    kp = p.kernel_params

    def full_spec(arr):
        nd = arr.ndim
        return pl.BlockSpec(arr.shape, lambda n, _nd=nd: (0,) * _nd)

    inputs = [x_taps]
    in_specs = [pl.BlockSpec((None, 4 * Cin, P), lambda n: (n, 0, 0))]
    if p.has_reduce_channel:
        for a in (kp["w1"], kp["b1"]):
            inputs.append(a)
            in_specs.append(full_spec(a))
    for a in (kp["w2"], kp["b2"]):
        inputs.append(a)
        in_specs.append(full_spec(a))
    for wk, bk in zip(kp["fc_w"], kp["fc_b"]):
        inputs.append(wk)
        in_specs.append(full_spec(wk))
        inputs.append(bk)
        in_specs.append(full_spec(bk))
    inputs.append(kp["w_pred"])
    in_specs.append(full_spec(kp["w_pred"]))
    inputs.append(kp["b_pred"])
    in_specs.append(full_spec(kp["b_pred"]))

    kernel = functools.partial(
        _fused_head_kernel,
        has_reduce=p.has_reduce_channel,
        num_fc=p.num_fc,
        conv_dim=C,
        P=P,
        fc_dim=p.fc_dim,
    )

    ci2 = kp["w2"].shape[1]
    flops_per_sample = 2 * (
        (Cin * C * H * W if p.has_reduce_channel else 0)
        + C * ci2 * P
        + C * P * p.fc_dim
        + (p.num_fc - 1) * p.fc_dim * p.fc_dim
        + p.fc_dim * out_dim
    )
    bytes_accessed = sum(int(a.size) * a.dtype.itemsize for a in inputs) \
        + N * out_dim * 4

    out = pl.pallas_call(
        kernel,
        out_shape=jax.ShapeDtypeStruct((N, 1, out_dim), x.dtype),
        grid=(N,),
        in_specs=in_specs,
        out_specs=pl.BlockSpec((None, 1, out_dim), lambda n: (n, 0, 0)),
        compiler_params=pltpu.CompilerParams(
            dimension_semantics=("parallel",),   # 2 TCs on v7x take one sample each
        ),
        cost_estimate=pl.CostEstimate(
            flops=N * flops_per_sample,
            transcendentals=0,
            bytes_accessed=bytes_accessed,
        ),
    )(*inputs)

    return out.reshape(
        N, p.num_classes, p.output_side_resolution, p.output_side_resolution
    )


# ----------------------------------------------------------------------------
# Pure-JAX reference (mirrors the PyTorch module) for a correctness check
# ----------------------------------------------------------------------------
def _reference_forward(p: CoarseMaskHeadParams, x):
    prec = jax.lax.Precision.HIGHEST
    N = x.shape[0]
    h = x.astype(jnp.float32).reshape(N, p.input_channels, p.input_h, p.input_w)
    if p.has_reduce_channel:
        h = jnp.einsum("oc,nchw->nohw", p.w_reduce_ch, h, precision=prec)
        h = jnp.maximum(h + p.b_reduce_ch[None, :, None, None], 0.0)
    C = p.conv_dim
    H2, W2 = p.input_h // 2, p.input_w // 2
    h6 = h.reshape(N, C, H2, 2, W2, 2)
    h = jnp.einsum("oikl,nihkwl->nohw", p.w_reduce_sp, h6, precision=prec)
    h = jnp.maximum(h + p.b_reduce_sp[None, :, None, None], 0.0)
    feat = h.reshape(N, -1)                      # torch.flatten(x, start_dim=1)
    for w, b in zip(p.fc_w, p.fc_b):
        feat = jnp.maximum(jnp.dot(feat, w.T, precision=prec) + b, 0.0)
    out = jnp.dot(feat, p.w_pred.T, precision=prec) + p.b_pred
    return out.reshape(
        N, p.num_classes, p.output_side_resolution, p.output_side_resolution
    )


# ----------------------------------------------------------------------------
if __name__ == "__main__":
    key = jax.random.PRNGKey(0)
    k_param, k_x = jax.random.split(key)

    params = CoarseMaskHeadParams(
        k_param,
        num_classes=4,
        conv_dim=4,
        fc_dim=32,
        num_fc=2,
        output_side_resolution=7,
        input_channels=8,
        input_h=16,
        input_w=16,
    )

    x = jax.random.normal(k_x, (2, 8, 16, 16), jnp.float32)

    fwd = jax.jit(lambda xx: coarse_mask_head_forward(params, xx))
    out = jax.block_until_ready(fwd(x))

    assert out.shape == (2, 4, 7, 7), out.shape
    assert out.dtype == jnp.float32
    assert bool(jnp.all(jnp.isfinite(out)))

    ref = jax.block_until_ready(_reference_forward(params, x))
    assert bool(jnp.allclose(out, ref, rtol=5e-2, atol=2e-3)), (
        float(jnp.max(jnp.abs(out - ref))))

    print("KERNEL_OK")
</pallas_src>

<mosaic_0001>
module attributes {stable_mosaic.version = 11 : i64} {
  func.func @_fused_head_kernel(%arg0: i32, %arg1: memref<1x32x64xf32, #tpu.memory_space<vmem>>, %arg2: memref<16x32xf32, #tpu.memory_space<vmem>>, %arg3: memref<16x1xf32, #tpu.memory_space<vmem>>, %arg4: memref<4x16xf32, #tpu.memory_space<vmem>>, %arg5: memref<4x1xf32, #tpu.memory_space<vmem>>, %arg6: memref<4x64x32xf32, #tpu.memory_space<vmem>>, %arg7: memref<1x32xf32, #tpu.memory_space<vmem>>, %arg8: memref<32x32xf32, #tpu.memory_space<vmem>>, %arg9: memref<1x32xf32, #tpu.memory_space<vmem>>, %arg10: memref<32x196xf32, #tpu.memory_space<vmem>>, %arg11: memref<1x196xf32, #tpu.memory_space<vmem>>, %arg12: memref<1x1x196xf32, #tpu.memory_space<vmem>>) attributes {dimension_semantics = [#tpu.dimension_semantics<parallel>], iteration_bounds = array<i64: 2>, scalar_prefetch = 0 : i64, scratch_operands = 0 : i64, tpu.core_type = #tpu.core_type<tc>, window_params = [{transform_indices = @transform_0, window_bounds = array<i64: 1, 32, 64>}, {pipeline_mode = #tpu.pipeline_mode<synchronous>, transform_indices = @transform_1, window_bounds = array<i64: 16, 32>}, {pipeline_mode = #tpu.pipeline_mode<synchronous>, transform_indices = @transform_2, window_bounds = array<i64: 16, 1>}, {pipeline_mode = #tpu.pipeline_mode<synchronous>, transform_indices = @transform_3, window_bounds = array<i64: 4, 16>}, {pipeline_mode = #tpu.pipeline_mode<synchronous>, transform_indices = @transform_4, window_bounds = array<i64: 4, 1>}, {pipeline_mode = #tpu.pipeline_mode<synchronous>, transform_indices = @transform_5, window_bounds = array<i64: 4, 64, 32>}, {pipeline_mode = #tpu.pipeline_mode<synchronous>, transform_indices = @transform_6, window_bounds = array<i64: 1, 32>}, {pipeline_mode = #tpu.pipeline_mode<synchronous>, transform_indices = @transform_7, window_bounds = array<i64: 32, 32>}, {pipeline_mode = #tpu.pipeline_mode<synchronous>, transform_indices = @transform_8, window_bounds = array<i64: 1, 32>}, {pipeline_mode = #tpu.pipeline_mode<synchronous>, transform_indices = @transform_9, window_bounds = array<i64: 32, 196>}, {pipeline_mode = #tpu.pipeline_mode<synchronous>, transform_indices = @transform_10, window_bounds = array<i64: 1, 196>}, {transform_indices = @transform_11, window_bounds = array<i64: 1, 1, 196>}]} {
    %c0 = arith.constant 0 : index
    %c0_0 = arith.constant 0 : index
    %c0_1 = arith.constant 0 : index
    %0 = vector.load %arg1[%c0, %c0_0, %c0_1] : memref<1x32x64xf32, #tpu.memory_space<vmem>>, vector<1x32x64xf32>
    %1 = vector.shape_cast %0 : vector<1x32x64xf32> to vector<32x64xf32>
    %c0_2 = arith.constant 0 : index
    %c0_3 = arith.constant 0 : index
    %2 = vector.load %arg2[%c0_2, %c0_3] : memref<16x32xf32, #tpu.memory_space<vmem>>, vector<16x32xf32>
    %cst = arith.constant dense<0.000000e+00> : vector<16x64xf32>
    %3 = tpu.matmul %2, %1, %cst {dimension_numbers = #tpu.dot_dimension_numbers<[1], [0], [0], [1], [0, 0, 1, 1], [], []>} : vector<16x32xf32>, vector<32x64xf32>, vector<16x64xf32> -> vector<16x64xf32>
    %c0_4 = arith.constant 0 : index
    %c0_5 = arith.constant 0 : index
    %4 = vector.load %arg3[%c0_4, %c0_5] : memref<16x1xf32, #tpu.memory_space<vmem>>, vector<16x1xf32>
    %5 = vector.broadcast %4 : vector<16x1xf32> to vector<16x64xf32>
    %6 = arith.addf %3, %5 : vector<16x64xf32>
    %cst_6 = arith.constant 0.000000e+00 : f32
    %7 = vector.broadcast %cst_6 : f32 to vector<16x64xf32>
    %8 = arith.maximumf %6, %7 : vector<16x64xf32>
    %c0_7 = arith.constant 0 : index
    %c0_8 = arith.constant 0 : index
    %9 = vector.load %arg4[%c0_7, %c0_8] : memref<4x16xf32, #tpu.memory_space<vmem>>, vector<4x16xf32>
    %cst_9 = arith.constant dense<0.000000e+00> : vector<4x64xf32>
    %10 = tpu.matmul %9, %8, %cst_9 {dimension_numbers = #tpu.dot_dimension_numbers<[1], [0], [0], [1], [0, 0, 1, 1], [], []>} : vector<4x16xf32>, vector<16x64xf32>, vector<4x64xf32> -> vector<4x64xf32>
    %c0_10 = arith.constant 0 : index
    %c0_11 = arith.constant 0 : index
    %11 = vector.load %arg5[%c0_10, %c0_11] : memref<4x1xf32, #tpu.memory_space<vmem>>, vector<4x1xf32>
    %12 = vector.broadcast %11 : vector<4x1xf32> to vector<4x64xf32>
    %13 = arith.addf %10, %12 : vector<4x64xf32>
    %cst_12 = arith.constant 0.000000e+00 : f32
    %14 = vector.broadcast %cst_12 : f32 to vector<4x64xf32>
    %15 = arith.maximumf %13, %14 : vector<4x64xf32>
    %cst_13 = arith.constant 0.000000e+00 : f32
    %16 = vector.broadcast %cst_13 : f32 to vector<1x32xf32>
    %17 = vector.extract_strided_slice %15 {offsets = [0, 0], sizes = [1, 64], strides = [1, 1]} : vector<4x64xf32> to vector<1x64xf32>
    %c0_14 = arith.constant 0 : index
    %c0_15 = arith.constant 0 : index
    %c0_16 = arith.constant 0 : index
    %18 = vector.load %arg6[%c0_14, %c0_15, %c0_16] : memref<4x64x32xf32, #tpu.memory_space<vmem>>, vector<1x64x32xf32>
    %19 = vector.shape_cast %18 : vector<1x64x32xf32> to vector<64x32xf32>
    %cst_17 = arith.constant dense<0.000000e+00> : vector<1x32xf32>
    %20 = tpu.matmul %17, %19, %cst_17 {dimension_numbers = #tpu.dot_dimension_numbers<[1], [0], [0], [1], [0, 0, 1, 1], [], []>} : vector<1x64xf32>, vector<64x32xf32>, vector<1x32xf32> -> vector<1x32xf32>
    %21 = arith.addf %16, %20 : vector<1x32xf32>
    %22 = vector.extract_strided_slice %15 {offsets = [1, 0], sizes = [1, 64], strides = [1, 1]} : vector<4x64xf32> to vector<1x64xf32>
    %c1 = arith.constant 1 : index
    %c0_18 = arith.constant 0 : index
    %c0_19 = arith.constant 0 : index
    %23 = vector.load %arg6[%c1, %c0_18, %c0_19] : memref<4x64x32xf32, #tpu.memory_space<vmem>>, vector<1x64x32xf32>
    %24 = vector.shape_cast %23 : vector<1x64x32xf32> to vector<64x32xf32>
    %cst_20 = arith.constant dense<0.000000e+00> : vector<1x32xf32>
    %25 = tpu.matmul %22, %24, %cst_20 {dimension_numbers = #tpu.dot_dimension_numbers<[1], [0], [0], [1], [0, 0, 1, 1], [], []>} : vector<1x64xf32>, vector<64x32xf32>, vector<1x32xf32> -> vector<1x32xf32>
    %26 = arith.addf %21, %25 : vector<1x32xf32>
    %27 = vector.extract_strided_slice %15 {offsets = [2, 0], sizes = [1, 64], strides = [1, 1]} : vector<4x64xf32> to vector<1x64xf32>
    %c2 = arith.constant 2 : index
    %c0_21 = arith.constant 0 : index
    %c0_22 = arith.constant 0 : index
    %28 = vector.load %arg6[%c2, %c0_21, %c0_22] : memref<4x64x32xf32, #tpu.memory_space<vmem>>, vector<1x64x32xf32>
    %29 = vector.shape_cast %28 : vector<1x64x32xf32> to vector<64x32xf32>
    %cst_23 = arith.constant dense<0.000000e+00> : vector<1x32xf32>
    %30 = tpu.matmul %27, %29, %cst_23 {dimension_numbers = #tpu.dot_dimension_numbers<[1], [0], [0], [1], [0, 0, 1, 1], [], []>} : vector<1x64xf32>, vector<64x32xf32>, vector<1x32xf32> -> vector<1x32xf32>
    %31 = arith.addf %26, %30 : vector<1x32xf32>
    %32 = vector.extract_strided_slice %15 {offsets = [3, 0], sizes = [1, 64], strides = [1, 1]} : vector<4x64xf32> to vector<1x64xf32>
    %c3 = arith.constant 3 : index
    %c0_24 = arith.constant 0 : index
    %c0_25 = arith.constant 0 : index
    %33 = vector.load %arg6[%c3, %c0_24, %c0_25] : memref<4x64x32xf32, #tpu.memory_space<vmem>>, vector<1x64x32xf32>
    %34 = vector.shape_cast %33 : vector<1x64x32xf32> to vector<64x32xf32>
    %cst_26 = arith.constant dense<0.000000e+00> : vector<1x32xf32>
    %35 = tpu.matmul %32, %34, %cst_26 {dimension_numbers = #tpu.dot_dimension_numbers<[1], [0], [0], [1], [0, 0, 1, 1], [], []>} : vector<1x64xf32>, vector<64x32xf32>, vector<1x32xf32> -> vector<1x32xf32>
    %36 = arith.addf %31, %35 : vector<1x32xf32>
    %c0_27 = arith.constant 0 : index
    %c0_28 = arith.constant 0 : index
    %37 = vector.load %arg7[%c0_27, %c0_28] : memref<1x32xf32, #tpu.memory_space<vmem>>, vector<1x32xf32>
    %38 = arith.addf %36, %37 : vector<1x32xf32>
    %cst_29 = arith.constant 0.000000e+00 : f32
    %39 = vector.broadcast %cst_29 : f32 to vector<1x32xf32>
    %40 = arith.maximumf %38, %39 : vector<1x32xf32>
    %c0_30 = arith.constant 0 : index
    %c0_31 = arith.constant 0 : index
    %41 = vector.load %arg8[%c0_30, %c0_31] : memref<32x32xf32, #tpu.memory_space<vmem>>, vector<32x32xf32>
    %cst_32 = arith.constant dense<0.000000e+00> : vector<1x32xf32>
    %42 = tpu.matmul %40, %41, %cst_32 {dimension_numbers = #tpu.dot_dimension_numbers<[1], [0], [0], [1], [0, 0, 1, 1], [], []>} : vector<1x32xf32>, vector<32x32xf32>, vector<1x32xf32> -> vector<1x32xf32>
    %c0_33 = arith.constant 0 : index
    %c0_34 = arith.constant 0 : index
    %43 = vector.load %arg9[%c0_33, %c0_34] : memref<1x32xf32, #tpu.memory_space<vmem>>, vector<1x32xf32>
    %44 = arith.addf %42, %43 : vector<1x32xf32>
    %cst_35 = arith.constant 0.000000e+00 : f32
    %45 = vector.broadcast %cst_35 : f32 to vector<1x32xf32>
    %46 = arith.maximumf %44, %45 : vector<1x32xf32>
    %c0_36 = arith.constant 0 : index
    %c0_37 = arith.constant 0 : index
    %47 = vector.load %arg10[%c0_36, %c0_37] : memref<32x196xf32, #tpu.memory_space<vmem>>, vector<32x196xf32>
    %cst_38 = arith.constant dense<0.000000e+00> : vector<1x196xf32>
    %48 = tpu.matmul %46, %47, %cst_38 {dimension_numbers = #tpu.dot_dimension_numbers<[1], [0], [0], [1], [0, 0, 1, 1], [], []>} : vector<1x32xf32>, vector<32x196xf32>, vector<1x196xf32> -> vector<1x196xf32>
    %c0_39 = arith.constant 0 : index
    %c0_40 = arith.constant 0 : index
    %49 = vector.load %arg11[%c0_39, %c0_40] : memref<1x196xf32, #tpu.memory_space<vmem>>, vector<1x196xf32>
    %50 = arith.addf %48, %49 : vector<1x196xf32>
    %c0_41 = arith.constant 0 : index
    %c0_42 = arith.constant 0 : index
    %c0_43 = arith.constant 0 : index
    %51 = vector.load %arg12[%c0_41, %c0_42, %c0_43] : memref<1x1x196xf32, #tpu.memory_space<vmem>>, vector<1x1x196xf32>
    %52 = vector.shape_cast %51 : vector<1x1x196xf32> to vector<1x196xf32>
    %53 = vector.shape_cast %50 : vector<1x196xf32> to vector<1x1x196xf32>
    tpu.vector_store %arg12[%c0_41, %c0_42, %c0_43], %53 {strides = array<i32>} : memref<1x1x196xf32, #tpu.memory_space<vmem>>, vector<1x1x196xf32>,
    return
  }
  func.func @transform_0(%arg0: i32) -> (i32, i32, i32) {
    %c0_i32 = arith.constant 0 : i32
    %c0_i32_0 = arith.constant 0 : i32
    %c0_i32_1 = arith.constant 0 : i32
    return %arg0, %c0_i32, %c0_i32_0 : i32, i32, i32
  }
  func.func @transform_1(%arg0: i32) -> (i32, i32) {
    %c0_i32 = arith.constant 0 : i32
    %c0_i32_0 = arith.constant 0 : i32
    %c0_i32_1 = arith.constant 0 : i32
    return %c0_i32, %c0_i32_0 : i32, i32
  }
  func.func @transform_2(%arg0: i32) -> (i32, i32) {
    %c0_i32 = arith.constant 0 : i32
    %c0_i32_0 = arith.constant 0 : i32
    %c0_i32_1 = arith.constant 0 : i32
    return %c0_i32, %c0_i32_0 : i32, i32
  }
  func.func @transform_3(%arg0: i32) -> (i32, i32) {
    %c0_i32 = arith.constant 0 : i32
    %c0_i32_0 = arith.constant 0 : i32
    %c0_i32_1 = arith.constant 0 : i32
    return %c0_i32, %c0_i32_0 : i32, i32
  }
  func.func @transform_4(%arg0: i32) -> (i32, i32) {
    %c0_i32 = arith.constant 0 : i32
    %c0_i32_0 = arith.constant 0 : i32
    %c0_i32_1 = arith.constant 0 : i32
    return %c0_i32, %c0_i32_0 : i32, i32
  }
  func.func @transform_5(%arg0: i32) -> (i32, i32, i32) {
    %c0_i32 = arith.constant 0 : i32
    %c0_i32_0 = arith.constant 0 : i32
    %c0_i32_1 = arith.constant 0 : i32
    %c0_i32_2 = arith.constant 0 : i32
    return %c0_i32, %c0_i32_0, %c0_i32_1 : i32, i32, i32
  }
  func.func @transform_6(%arg0: i32) -> (i32, i32) {
    %c0_i32 = arith.constant 0 : i32
    %c0_i32_0 = arith.constant 0 : i32
    %c0_i32_1 = arith.constant 0 : i32
    return %c0_i32, %c0_i32_0 : i32, i32
  }
  func.func @transform_7(%arg0: i32) -> (i32, i32) {
    %c0_i32 = arith.constant 0 : i32
    %c0_i32_0 = arith.constant 0 : i32
    %c0_i32_1 = arith.constant 0 : i32
    return %c0_i32, %c0_i32_0 : i32, i32
  }
  func.func @transform_8(%arg0: i32) -> (i32, i32) {
    %c0_i32 = arith.constant 0 : i32
    %c0_i32_0 = arith.constant 0 : i32
    %c0_i32_1 = arith.constant 0 : i32
    return %c0_i32, %c0_i32_0 : i32, i32
  }
  func.func @transform_9(%arg0: i32) -> (i32, i32) {
    %c0_i32 = arith.constant 0 : i32
    %c0_i32_0 = arith.constant 0 : i32
    %c0_i32_1 = arith.constant 0 : i32
    return %c0_i32, %c0_i32_0 : i32, i32
  }
  func.func @transform_10(%arg0: i32) -> (i32, i32) {
    %c0_i32 = arith.constant 0 : i32
    %c0_i32_0 = arith.constant 0 : i32
    %c0_i32_1 = arith.constant 0 : i32
    return %c0_i32, %c0_i32_0 : i32, i32
  }
  func.func @transform_11(%arg0: i32) -> (i32, i32, i32) {
    %c0_i32 = arith.constant 0 : i32
    %c0_i32_0 = arith.constant 0 : i32
    %c0_i32_1 = arith.constant 0 : i32
    return %arg0, %c0_i32, %c0_i32_0 : i32, i32, i32
  }
}

</mosaic_0001>

<bundles_post_ra>
// kernel: _lambda_.1
= control target key start
LH: loop header
LB: loop body
LE: loop exit
PB: predicated region body
PF: predicated region fallthrough
CT: control target
= control target key end

     0   :  { %s1511_s17 = smov 0   ;;  %s1731_s0 = inlined_call_operand.vmem [shape: f32[2,32,64], index: 0, kind: input, shape index: {}]   ;;  %s1732_s1 = inlined_call_operand.vmem [shape: f32[16,32], index: 1, kind: input, shape index: {}]   ;;  %s1733_s2 = inlined_call_operand.vmem [shape: f32[16,1], index: 2, kind: input, shape index: {}]   ;;  %s1734_s3 = inlined_call_operand.vmem [shape: f32[4,16], index: 3, kind: input, shape index: {}]   ;;  %s1735_s4 = inlined_call_operand.vmem [shape: f32[4,1], index: 4, kind: input, shape index: {}]   ;;  %s1736_s5 = inlined_call_operand.vmem [shape: f32[4,64,32], index: 5, kind: input, shape index: {}]   ;;  %s1737_s6 = inlined_call_operand.vmem [shape: f32[1,32], index: 6, kind: input, shape index: {}, may-alias: {6,8}]   ;;  %s1738_s7 = inlined_call_operand.vmem [shape: f32[32,32], index: 7, kind: input, shape index: {}]   ;;  %s1739_s8 = inlined_call_operand.vmem [shape: f32[1,32], index: 8, kind: input, shape index: {}, may-alias: {6,8}]   ;;  %s1740_s9 = inlined_call_operand.vmem [shape: f32[32,196], index: 9, kind: input, shape index: {}]   ;;  %s1741_s10 = inlined_call_operand.vmem [shape: f32[1,196], index: 10, kind: input, shape index: {}]   ;;  %s1742_s11 = inlined_call_operand.vmem [shape: f32[2,1,196], index: 11, kind: output, shape index: {}]  }
   0x1 LB: > { %s1151_s18 = sadd.s32 4294967295, %s1444_s17   ;;  %p1155_p0 = scmp.ge.s32.totalorder %s1444_s17, 1  ;;  %s1444_s17 = sphi %s1511_s17, %s21_s17  }
   0x2   : > { %p337_p1 = scmp.lt.s32.totalorder %s1444_s17, 3 }
   0x4   : > { %p338_p2 = pnand %p1155_p0, %p337_p1 }
   0x5   : > { %p376_p3 = scmp.lt.s32.totalorder (!%p338_p2), %s1151_s18, 1  ;;  %v389_v0 = vld [vmem:[%s1732_s1] sm:$0xff] (!%p338_p2)  ;;  %vm403_vm0 = vcmask (!%p338_p2), 261120   ;;  %v1446_v2 = vmov (!%p338_p2), 0   ;;  %v392_v3 = vld [vmem:[%s1733_s2 + $0x8] sm:$0xff] (!%p338_p2)  ;;  %v1447_v11 = vmov (!%p338_p2), 0.0|0.0  }
   0x6   : > { %341 = sbr.rel (%p338_p2) target bundleno = 1141 (0x475), region = 64  ;;  %v391_v1 = vld [vmem:[%s1733_s2] sm:$0xff] (!%p338_p2)  ;;  %1253 = vmatprep.mubr.msk.f32.mxu0 (!%p338_p2), %vm403_vm0, %v389_v0  ;;  %1436 = vset.pattern.permute.xlu0 (!%p338_p2), %v1446_v2  ;;  %v390_v10 = vld [vmem:[%s1732_s1 + $0x8] sm:$0xff] (!%p338_p2)  ;;  %vm1448_vm1 = vmmov (!%p338_p2), 0   ;;  %v1449_v12 = vmov (!%p338_p2), 0.0   ;;  %v571_v17 = vld [vmem:[%s1736_s5 + $0x10] sm:$0xff] (!%p338_p2) }
   0x7   : > { %395 = vperm.xlu0 (!%p338_p2), %1436, %v391_v1   ;;  %1437 = vset.pattern.permute.xlu1 (!%p338_p2), %v1446_v2  ;;  %v488_v13 = vld [vmem:[%s1735_s4] sm:$0xf] (!%p338_p2)  ;;  %v570_v15 = vld [vmem:[%s1736_s5 + $0x8] sm:$0xff] (!%p338_p2)  ;;  %v572_v18 = vld [vmem:[%s1736_s5 + $0x18] sm:$0xff] (!%p338_p2)  ;;  %vm494_vm2 = vcmask (!%p338_p2), 130048   ;;  %vm588_vm3 = vcmask (!%p338_p2), 523264  }
   0x8   : > { %1358 = vmatprep.subr.bf16.mxu1 (!%p338_p2), %v1447_v11  ;;  %1260 = vmatprep.mubr.msk.f32.mxu1 (!%p338_p2), %vm1448_vm1, %v1449_v12  ;;  %v569_v14 = vld [vmem:[%s1736_s5] sm:$0xff] (!%p338_p2)  ;;  %v1377_v19 = vpack.c.bf16 (!%p338_p2), %v572_v18, %v571_v17  ;;  %v574_v21 = vld [vmem:[%s1736_s5 + $0x28] sm:$0xff] (!%p338_p2)  ;;  %v1164_v36 = vld [vmem:[%s1736_s5 + $0x50] sm:$0xff] (!%p338_p2) }
   0x9   : > { %491 = vperm.xlu1 (!%p338_p2), %1437, %v488_v13   ;;  %v1374_v16 = vpack.c.bf16 (!%p338_p2), %v570_v15, %v569_v14  ;;  %v573_v20 = vld [vmem:[%s1736_s5 + $0x20] sm:$0xff] (!%p338_p2)  ;;  %v1163_v32 = vld [vmem:[%s1736_s5 + $0x48] sm:$0xff] (!%p338_p2)  ;;  %v1165_v37 = vld [vmem:[%s1736_s5 + $0x58] sm:$0xff] (!%p338_p2) }
   0xa   : > { %v1380_v22 = vpack.c.bf16 (!%p338_p2), %v574_v21, %v573_v20  ;;  %v1162_v31 = vld [vmem:[%s1736_s5 + $0x40] sm:$0xff] (!%p338_p2)  ;;  %v1365_v38 = vpack.c.bf16 (!%p338_p2), %v1165_v37, %v1164_v36  ;;  %v1167_v40 = vld [vmem:[%s1736_s5 + $0x68] sm:$0xff] (!%p338_p2)  ;;  %v575_v42 = vld [vmem:[%s1736_s5 + $0x30] sm:$0xff] (!%p338_p2) }
   0xb   : > { %400 = vperm.xlu0 (!%p338_p2), %1436, %v392_v3   ;;  %v487_v34 = vld [vmem:[%s1734_s3] sm:$0xf] (!%p338_p2)  ;;  %v1362_v35 = vpack.c.bf16 (!%p338_p2), %v1163_v32, %v1162_v31  ;;  %v576_v43 = vld [vmem:[%s1736_s5 + $0x38] sm:$0xff] (!%p338_p2)  ;;  %v1168_v45 = vld [vmem:[%s1736_s5 + $0x70] sm:$0xff] (!%p338_p2) }
   0xc   : > { %v1166_v39 = vld [vmem:[%s1736_s5 + $0x60] sm:$0xff] (!%p338_p2)  ;;  %v1383_v44 = vpack.c.bf16 (!%p338_p2), %v576_v43, %v575_v42  ;;  %v1169_v46 = vld [vmem:[%s1736_s5 + $0x78] sm:$0xff] (!%p338_p2)  ;;  %v1182_v50 = vld [vmem:[%s1736_s5 + $0xc8] sm:$0xff] (!%p338_p2) }
   0xd   : > { %s1744_s18 = smov (!%p376_p3, %s1151_s18), 1  ;;  %v1368_v41 = vpack.c.bf16 %v1167_v40, %v1166_v39  ;;  %v1371_v47 = vpack.c.bf16 %v1169_v46, %v1168_v45  ;;  %v1181_v49 = vld [vmem:[%s1736_s5 + $0xc0] sm:$0xff]  ;;  %v1173_v55 = vld [vmem:[%s1736_s5 + $0x88] sm:$0xff]  ;;  %v1183_v58 = vld [vmem:[%s1736_s5 + $0xd0] sm:$0xff] }
   0xe   : > { %s1194_s25 = sshll.u32 %s1744_s18, 5  ;;  %v1172_v54 = vld [vmem:[%s1736_s5 + $0x80] sm:$0xff]  ;;  %v1398_v56 = vpack.c.bf16 %v1182_v50, %v1181_v49  ;;  %v1184_v59 = vld [vmem:[%s1736_s5 + $0xd8] sm:$0xff]  ;;  %v1174_v62 = vld [vmem:[%s1736_s5 + $0x90] sm:$0xff]  ;;  %s1158_s27 = sshll.u32 %s1744_s18, 1 }
   0xf   : > { %s380_s28 = scalar_lea.vmem %s1731_s0, %s1194_s25  ;;  %v1386_v60 = vpack.c.bf16 %v1173_v55, %v1172_v54  ;;  %v1175_v63 = vld [vmem:[%s1736_s5 + $0x98] sm:$0xff]  ;;  %v1401_v0 = vpack.c.bf16 %v1184_v59, %v1183_v58  ;;  %v1185_v1 = vld [vmem:[%s1736_s5 + $0xe0] sm:$0xff]  ;;  %v1186_v2 = vld [vmem:[%s1736_s5 + $0xe8] sm:$0xff]  ;;  %v1450_v58 = vmov 1966171168   ;;  %s384_s30 = scalar_lea.vmem %s1742_s11, %s1158_s27 }
  0x10   : > { %v385_v4 = vld [vmem:[%s380_s28] sm:$0xff]  ;;  %v386_v5 = vld [vmem:[%s380_s28 + $0x8] sm:$0xff]  ;;  %v387_v6 = vld [vmem:[%s380_s28 + $0x10] sm:$0xff]  ;;  %v1389_v3 = vpack.c.bf16 %v1175_v63, %v1174_v62  ;;  %v1079_v59 = vunpack.c.l.s4 %v1450_v58 }
  0x11   : > { %v1350_v7 = vpack.c.bf16 %v386_v5, %v385_v4  ;;  %v388_v8 = vld [vmem:[%s380_s28 + $0x18] sm:$0xff]  ;;  %v1176_v4 = vld [vmem:[%s1736_s5 + $0xa0] sm:$0xff]  ;;  %v1177_v5 = vld [vmem:[%s1736_s5 + $0xa8] sm:$0xff] }
  0x12   : > { %v1354_v9 = vpack.c.bf16 %v388_v8, %v387_v6  ;;  %v1404_v6 = vpack.c.bf16 %v1186_v2, %v1185_v1  ;;  %v1188_v8 = vld [vmem:[%s1736_s5 + $0xf8] sm:$0xff]  ;;  %v902_v18 = vld [vmem:[%s1738_s7] sm:$0xff]  ;;  %v904_v21 = vld [vmem:[%s1738_s7 + $0x10] sm:$0xff]  ;;  %v1080_v62 = vunpack.c.0.s8 %v1079_v59 }
  0x13   : > { %1351 = vmatprep.subr.bf16.mxu0 %v1350_v7  ;;  %v1179_v13 = vld [vmem:[%s1736_s5 + $0xb8] sm:$0xff]  ;;  %v986_v42 = vld [vmem:[%s1740_s9 + $0x28] sm:$0xff]  ;;  %v985_v45 = vld [vmem:[%s1740_s9 + $0x20] sm:$0xff] }
  0x14   : > { %1353 = vmatpush3.bf16.msra.mxu0 %v1350_v7  ;;  %v1187_v7 = vld [vmem:[%s1736_s5 + $0xf0] sm:$0xff]  ;;  %v988_v43 = vld [vmem:[%s1740_s9 + $0x38] sm:$0xff] }
  0x15   : > { %1355 = vmatprep.subr.bf16.mxu0 %v1354_v9  ;;  %v1407_v14 = vpack.c.bf16 %v1188_v8, %v1187_v7  ;;  %v987_v46 = vld [vmem:[%s1740_s9 + $0x30] sm:$0xff] }
  0x18   : > { %1357 = vmatpush3.bf16.msra.mxu0 %v1354_v9  ;;  %v1392_v9 = vpack.c.bf16 %v1177_v5, %v1176_v4 }
  0x19   : > { %1373 = vmatprep.subr.bf16.mxu0 %v1447_v11 }
  0x1b   : > { %1254 = vmatmul.mubr.msk.f32.vlgmr.msra.gmra.mrb[0].mxu0 %vm403_vm0, %v390_v10  ;;  %v1178_v10 = vld [vmem:[%s1736_s5 + $0xb0] sm:$0xff] }
  0x1c   : > { %1298 = vmatprep.mubr.msk.f32.mxu0 %vm1448_vm1, %v1449_v12  ;;  %1375 = vmatpush3.bf16.msra.mxu0 %v1374_v16  ;;  %v1395_v15 = vpack.c.bf16 %v1179_v13, %v1178_v10 }
  0x1d   : > { %1376 = vmatprep.subr.bf16.mxu0 %v1447_v11 }
  0x20   : > { %1378 = vmatpush3.bf16.msra.mxu0 %v1377_v19  ;;  %v903_v19 = vld [vmem:[%s1738_s7 + $0x8] sm:$0xff] }
  0x21   : > { %1379 = vmatprep.subr.bf16.mxu0 %v1447_v11  ;;  %v1410_v20 = vpack.c.bf16 %v903_v19, %v902_v18 }
  0x24   : > { %1381 = vmatpush3.bf16.msra.mxu0 %v1380_v22 }
  0x25   : > { %1382 = vmatprep.subr.bf16.mxu0 %v1447_v11 }
  0x28   : > { %1384 = vmatpush3.bf16.msra.mxu0 %v1383_v44  ;;  %v1419_v44 = vpack.c.bf16 %v988_v43, %v986_v42 }
  0x29   : > { %1397 = vmatprep.subr.bf16.mxu0 %v1447_v11 }
  0x86   : > { %v396_v23 = vpop.permute.xlu0 %395 }
  0x88   : > { %v492_v48 = vpop.permute.xlu1 %491 }
  0x8a   : > { %v401_v24 = vpop.permute.xlu0 %400 }
  0xee   : > { %v1255_v25 = vpop.f32.mrb[0].mxu0 }
  0xef   : > { %v482_v26 = vadd.f32 %v1255_v25, %v401_v24  ;;  %v476_v27 = vpop.f32.mrb[1].mxu0  ;;  %v984_v24 = vld [vmem:[%s1740_s9 + $0x18] sm:$0xff] }
  0xf0   : > { %v477_v28 = vadd.f32 %v476_v27, %v396_v23  ;;  %v982_v23 = vld [vmem:[%s1740_s9 + $0x8] sm:$0xff] }
  0xf1   : > { %v486_v29 = vmax.f32 %v482_v26, 0.0  ;;  %v1415_v25 = vpack.c.bf16 %v984_v24, %v982_v23  ;;  %v983_v26 = vld [vmem:[%s1740_s9 + $0x10] sm:$0xff] }
  0xf2   : > { %v485_v30 = vmax.f32 %v477_v28, 0.0 }
  0xf4   : > { %v1359_v33 = vpack.c.bf16 %v486_v29, %v485_v30 }
  0xf6   : > { %1360 = vmatpush3.bf16.msra.mxu1 %v1359_v33 }
  0xf7   : > { %1361 = vmatprep.subr.bf16.mxu1 %v1447_v11 }
  0xf9   : > { %1261 = vmatmul.mubr.msk.f32.vlgmr.msra.gmra.mrb[0].mxu1 %vm494_vm2, %v487_v34 }
  0xfa   : > { %1363 = vmatpush3.bf16.msra.mxu1 %v1362_v35  ;;  %1279 = vmatprep.mubr.msk.f32.mxu1 %vm1448_vm1, %v1449_v12 }
  0xfb   : > { %1364 = vmatprep.subr.bf16.mxu1 %v1447_v11 }
  0xfe   : > { %1366 = vmatpush3.bf16.msra.mxu1 %v1365_v38  ;;  %v899_v38 = vld [vmem:[%s1737_s6] sm:$0x1] }
  0xff   : > { %1367 = vmatprep.subr.bf16.mxu1 %v1447_v11 }
 0x102   : > { %1369 = vmatpush3.bf16.msra.mxu1 %v1368_v41 }
 0x103   : > { %1370 = vmatprep.subr.bf16.mxu1 %v1447_v11 }
 0x106   : > { %1372 = vmatpush3.bf16.msra.mxu1 %v1371_v47  ;;  %v1421_v47 = vpack.c.bf16 %v987_v46, %v985_v45 }
 0x107   : > { %1385 = vmatprep.subr.bf16.mxu1 %v1447_v11 }
 0x1cc   : > { %v564_v51 = vpop.f32.mrb[0].mxu1 }
 0x1cd   : > { %v565_v52 = vadd.f32 %v564_v51, %v492_v48  ;;  %v1262_v53 = vpop.f32.mrb[1].mxu1  ;;  %v906_v48 = vld [vmem:[%s1739_s8] sm:$0x1] }
 0x1ce   : > { %v991_v53 = vlaneseq }
 0x1cf   : > { %v568_v57 = vmax.f32 %v565_v52, 0.0 }
 0x1d0   : > { %v992_v54 = vshrl.u32 %v991_v53, 7  ;;  %vm1095_vm4 = vcmp.lt.s32.totalorder %v991_v53, 196 }
 0x1d1   : > { %v587_v61 = vrot.slane %v568_v57, 1  ;;  %1299 = vmatmul.mubr.msk.f32.vlgmr.msra.gmra.mrb[2].mxu0 %vm588_vm3, %v568_v57  ;;  %v825_v16 = vrot.slane %v568_v57, 3  ;;  %v742_v17 = vrot.slane %v568_v57, 2 }
 0x1d2   : > { %1399 = vmatpush3.bf16.msra.mxu0 %v1398_v56  ;;  %1336 = vmatprep.mubr.msk.f32.mxu0 %vm1448_vm1, %v1449_v12  ;;  %v993_v55 = vsub.s32 0, %v992_v54  ;;  %v989_v56 = vld [vmem:[%s1741_s10] sm:$0x3]  ;;  %v997_v57 = vsub.s32 1, %v992_v54 }
 0x1d3   : > { %1280 = vmatmul.mubr.msk.f32.vlgmr.msra.gmra.mrb[2].mxu1 %vm588_vm3, %v587_v61  ;;  %1400 = vmatprep.subr.bf16.mxu0 %v1447_v11 }
 0x1d4   : > { %1387 = vmatpush3.bf16.msra.mxu1 %v1386_v60  ;;  %1317 = vmatprep.mubr.msk.f32.mxu1 %vm1448_vm1, %v1449_v12  ;;  %v994_v60 = vrot.slane %v989_v56, %v993_v55  ;;  %v998_v61 = vrot.slane %v989_v56, %v997_v57 }
 0x1d5   : > { %1388 = vmatprep.subr.bf16.mxu1 %v1447_v11 }
 0x1d6   : > { %1402 = vmatpush3.bf16.msra.mxu0 %v1401_v0 }
 0x1d7   : > { %1403 = vmatprep.subr.bf16.mxu0 %v1447_v11 }
 0x1d8   : > { %1390 = vmatpush3.bf16.msra.mxu1 %v1389_v3  ;;  %v1083_v3 = vsub.s32 %v1080_v62, %v992_v54 }
 0x1d9   : > { %1391 = vmatprep.subr.bf16.mxu1 %v1447_v11 }
 0x1da   : > { %1405 = vmatpush3.bf16.msra.mxu0 %v1404_v6 }
 0x1db   : > { %1406 = vmatprep.subr.bf16.mxu0 %v1447_v11 }
 0x1dc   : > { %1393 = vmatpush3.bf16.msra.mxu1 %v1392_v9 }
 0x1dd   : > { %1394 = vmatprep.subr.bf16.mxu1 %v1447_v11 }
 0x1de   : > { %1408 = vmatpush3.bf16.msra.mxu0 %v1407_v14 }
 0x1df   : > { %1416 = vmatprep.subr.bf16.mxu0 %v1415_v25 }
 0x1e0   : > { %1396 = vmatpush3.bf16.msra.mxu1 %v1395_v15 }
 0x1e1   : > { %1337 = vmatmul.mubr.msk.f32.vlgmr.msra.gmra.mrb[4].mxu0 %vm588_vm3, %v825_v16  ;;  %1409 = vmatprep.subr.bf16.mxu1 %v1447_v11 }
 0x1e2   : > { %1068 = vmatprep.mubr.f32.mxu0 %v1449_v12 }
 0x1e3   : > { %1318 = vmatmul.mubr.msk.f32.vlgmr.msra.gmra.mrb[4].mxu1 %vm588_vm3, %v742_v17 }
 0x1e4   : > { %1347 = vmatprep.mubr.msk.f32.mxu1 %vm1448_vm1, %v1449_v12  ;;  %1411 = vmatpush3.bf16.msra.mxu1 %v1410_v20  ;;  %v905_v12 = vld [vmem:[%s1738_s7 + $0x18] sm:$0xff] }
 0x1e5   : > { %1412 = vmatprep.subr.bf16.mxu1 %v1447_v11  ;;  %v1413_v22 = vpack.c.bf16 %v905_v12, %v904_v21  ;;  %v981_v11 = vld [vmem:[%s1740_s9] sm:$0xff] }
 0x1e6   : > { %v1417_v27 = vpack.c.bf16 %v983_v26, %v981_v11 }
 0x1e8   : > { %1414 = vmatpush3.bf16.msra.mxu1 %v1413_v22  ;;  %1418 = vmatpush1.bf16.msra.mxu0 %v1417_v27 }
 0x1e9   : > { %1420 = vmatprep.subr.bf16.mxu0 %v1419_v44 }
 0x1ec   : > { %1422 = vmatpush1.bf16.msra.mxu0 %v1421_v47 }
 0x2a4   : > { %v729_v28 = vpop.f32.mrb[2].mxu0 }
 0x2a5   : > { %v1300_v29 = vpop.f32.mrb[3].mxu0 }
 0x2a6   : > { %v657_v30 = vpop.f32.mrb[2].mxu1 }
 0x2a7   : > { %v730_v31 = vadd.f32 %v729_v28, %v657_v30  ;;  %v1281_v32 = vpop.f32.mrb[3].mxu1 }
 0x2b4   : > { %v894_v33 = vpop.f32.mrb[4].mxu0 }
 0x2b5   : > { %v1338_v34 = vpop.f32.mrb[5].mxu0 }
 0x2b6   : > { %v811_v35 = vpop.f32.mrb[4].mxu1 }
 0x2b7   : > { %v815_v36 = vadd.f32 %v811_v35, %v730_v31  ;;  %v1319_v37 = vpop.f32.mrb[5].mxu1 }
 0x2b9   : > { %v898_v39 = vadd.f32 %v894_v33, %v815_v36 }
 0x2bb   : > { %v900_v40 = vadd.f32 %v899_v38, %v898_v39 }
 0x2bd   : > { %v901_v41 = vmax.f32 %v900_v40, 0.0 }
 0x2bf   : > { %1348 = vmatmul.mubr.msk.f32.vlgmr.msra.gmra.mrb[6].mxu1 %vm403_vm0, %v901_v41 }
 0x392   : > { %v976_v49 = vpop.f32.mrb[6].mxu1 }
 0x393   : > { %v977_v50 = vadd.f32 %v976_v49, %v906_v48  ;;  %v1349_v51 = vpop.f32.mrb[7].mxu1 }
 0x395   : > { %v980_v52 = vmax.f32 %v977_v50, 0.0 }
 0x397   : > { %1191 = vmatmul.mubr.msk.f32.vlgmr.msra.gmra.mrb[6].mxu0 %vm403_vm0, %v980_v52 }
 0x46a   : > { %v1070_v63 = vpop.f32.mrb[6].mxu0 }
 0x46b   : > { %v1071_v0 = vadd.f32 %v1070_v63, %v994_v60  ;;  %v1072_v1 = vpop.f32.mrb[7].mxu0 }
 0x46c   : > { %v1073_v2 = vadd.f32 %v1072_v1, %v998_v61 }
 0x46e   : > { %v1077_v4 = vcombine.low %v1071_v0, %v1073_v2 }
 0x470   : > { %v1084_v5 = vrot.slane %v1077_v4, %v1083_v3 }
 0x472   : > { %v1091_v6 = vrot.slane %v1084_v5, %v1083_v3 }
 0x474   : > { %1097 = vst.msk [vmem:[%s384_s30] sm:$0x3] %vm1095_vm4, %v1091_v6 }
 0x475 PF: > { %s21_s17 = sadd.s32 1, %s1444_s17  }
 0x476   : > { %p18_p4 = scmp.ge.s32.totalorder %s21_s17, 4  }
 0x478   :  { %20 = sbr.rel (!%p18_p4) target bundleno = 1 (0x1), region = 97 }

</bundles_post_ra>
